<compile_context>
chip_gen: v7x
topology: tpu7x:2x2x1
jax: 0.10.0
libtpu: 0.0.40
codegen_flags: <defaults>
</compile_context>

<pallas_src>
import jax
import jax.numpy as jnp
from jax.experimental import pallas as pl
from jax.experimental.pallas import tpu as pltpu


def _normalize_kernel(x_ref, mean_ref, inv_std_ref, o_ref):
    # Pure VPU hot path: per-row broadcast of (block_rows, 1) columns over lanes.
    x = x_ref[...]
    m = mean_ref[...]          # (block_rows, 1)
    inv_s = inv_std_ref[...]   # (block_rows, 1), exact precomputed 1/std
    o_ref[...] = ((x - m) * inv_s).astype(o_ref.dtype)


def _pick_block(dim: int, align: int, target: int) -> int:
    """Largest legal block along one axis: the full dim if it fits the target,
    otherwise the biggest multiple of `align` not exceeding `target`."""
    if dim <= target:
        return dim                          # full-extent blocks are always legal
    return max((target // align) * align, align)


def image_normalize(x: jax.Array, mean: jax.Array, std: jax.Array,
                    *, row_block_target: int = 256,
                    col_block_target: int = 2048) -> jax.Array:
    """x: (N, C, H, W); mean/std: (1, C, 1, 1). Returns (x - mean) / std."""
    N, C, H, W = x.shape
    assert mean.shape == (1, C, 1, 1) and std.shape == (1, C, 1, 1)
    rows, cols = N * C, H * W

    # Lane-dense 2D view; free for contiguous NCHW.
    x2 = x.reshape(rows, cols)

    # Tiny (N*C, 1) per-row columns built in the wrapper (N*C elements — negligible).
    # inv_std is the *exact* f32 reciprocal, so results stay within a few ulps of
    # the true (x - mean) / std.
    mean_c = mean.reshape(1, C).astype(jnp.float32)
    inv_std_c = (1.0 / std.reshape(1, C)).astype(jnp.float32)
    mean_col = jnp.broadcast_to(mean_c, (N, C)).reshape(rows, 1)
    inv_std_col = jnp.broadcast_to(inv_std_c, (N, C)).reshape(rows, 1)

    br = _pick_block(rows, 8, row_block_target)      # multiple of 8 (or full rows)
    bc = _pick_block(cols, 128, col_block_target)    # multiple of 128 (or full cols)
    grid = (pl.cdiv(rows, br), pl.cdiv(cols, bc))

    out2 = pl.pallas_call(
        _normalize_kernel,
        out_shape=jax.ShapeDtypeStruct((rows, cols), x.dtype),
        grid_spec=pltpu.PrefetchScalarGridSpec(
            num_scalar_prefetch=0,
            grid=grid,
            in_specs=[
                pl.BlockSpec((br, bc), lambda i, j: (i, j)),
                pl.BlockSpec((br, 1), lambda i, j: (i, 0)),
                pl.BlockSpec((br, 1), lambda i, j: (i, 0)),
            ],
            out_specs=pl.BlockSpec((br, bc), lambda i, j: (i, j)),
        ),
        compiler_params=pltpu.CompilerParams(
            dimension_semantics=("parallel", "parallel"),
            # 2 MiB/tile * (in + out) * double-buffering ≈ 8 MiB — well under the
            # 32 MiB scoped default on every generation (incl. v7x's 64 MiB VMEM).
            vmem_limit_bytes=32 * 1024 * 1024,
        ),
    )(x2, mean_col, inv_std_col)

    return out2.reshape(N, C, H, W)


if __name__ == "__main__":
    # Deterministic buffers from the module __init__ (standard ImageNet constants).
    mean = jnp.asarray([0.485, 0.456, 0.406], dtype=jnp.float32).reshape(1, 3, 1, 1)
    std = jnp.asarray([0.229, 0.224, 0.225], dtype=jnp.float32).reshape(1, 3, 1, 1)

    # Small NCHW input consistent with the module: batch=2, channels=3, 16x16.
    key = jax.random.PRNGKey(0)
    x = jax.random.uniform(key, (2, 3, 16, 16), dtype=jnp.float32)

    out = image_normalize(x, mean, std)
    out = jax.block_until_ready(out)

    # Sanity check against the exact plain-JAX reference (divide form).
    ref = (x - mean) / std
    assert out.shape == x.shape and out.dtype == x.dtype
    assert jnp.allclose(out, ref, atol=1e-5, rtol=1e-5)

    print("KERNEL_OK")
</pallas_src>

<mosaic_0001>
module attributes {stable_mosaic.version = 11 : i64} {
  func.func @_normalize_kernel(%arg0: i32, %arg1: i32, %arg2: memref<6x256xf32, #tpu.memory_space<vmem>>, %arg3: memref<6x1xf32, #tpu.memory_space<vmem>>, %arg4: memref<6x1xf32, #tpu.memory_space<vmem>>, %arg5: memref<6x256xf32, #tpu.memory_space<vmem>>) attributes {dimension_semantics = [#tpu.dimension_semantics<parallel>, #tpu.dimension_semantics<parallel>], iteration_bounds = array<i64: 1, 1>, scalar_prefetch = 0 : i64, scratch_operands = 0 : i64, tpu.core_type = #tpu.core_type<tc>, window_params = [{transform_indices = @transform_0, window_bounds = array<i64: 6, 256>}, {transform_indices = @transform_1, window_bounds = array<i64: 6, 1>}, {transform_indices = @transform_2, window_bounds = array<i64: 6, 1>}, {transform_indices = @transform_3, window_bounds = array<i64: 6, 256>}]} {
    %c0 = arith.constant 0 : index
    %c0_0 = arith.constant 0 : index
    %0 = vector.load %arg2[%c0, %c0_0] : memref<6x256xf32, #tpu.memory_space<vmem>>, vector<6x256xf32>
    %c0_1 = arith.constant 0 : index
    %c0_2 = arith.constant 0 : index
    %1 = vector.load %arg3[%c0_1, %c0_2] : memref<6x1xf32, #tpu.memory_space<vmem>>, vector<6x1xf32>
    %c0_3 = arith.constant 0 : index
    %c0_4 = arith.constant 0 : index
    %2 = vector.load %arg4[%c0_3, %c0_4] : memref<6x1xf32, #tpu.memory_space<vmem>>, vector<6x1xf32>
    %3 = vector.broadcast %1 : vector<6x1xf32> to vector<6x256xf32>
    %4 = arith.subf %0, %3 : vector<6x256xf32>
    %5 = vector.broadcast %2 : vector<6x1xf32> to vector<6x256xf32>
    %6 = arith.mulf %4, %5 : vector<6x256xf32>
    %c0_5 = arith.constant 0 : index
    %c0_6 = arith.constant 0 : index
    %7 = vector.load %arg5[%c0_5, %c0_6] : memref<6x256xf32, #tpu.memory_space<vmem>>, vector<6x256xf32>
    tpu.vector_store %arg5[%c0_5, %c0_6], %6 {strides = array<i32>} : memref<6x256xf32, #tpu.memory_space<vmem>>, vector<6x256xf32>,
    return
  }
  func.func @transform_0(%arg0: i32, %arg1: i32) -> (i32, i32) {
    %c0_i32 = arith.constant 0 : i32
    return %arg0, %arg1 : i32, i32
  }
  func.func @transform_1(%arg0: i32, %arg1: i32) -> (i32, i32) {
    %c0_i32 = arith.constant 0 : i32
    %c0_i32_0 = arith.constant 0 : i32
    return %arg0, %c0_i32 : i32, i32
  }
  func.func @transform_2(%arg0: i32, %arg1: i32) -> (i32, i32) {
    %c0_i32 = arith.constant 0 : i32
    %c0_i32_0 = arith.constant 0 : i32
    return %arg0, %c0_i32 : i32, i32
  }
  func.func @transform_3(%arg0: i32, %arg1: i32) -> (i32, i32) {
    %c0_i32 = arith.constant 0 : i32
    return %arg0, %arg1 : i32, i32
  }
}

</mosaic_0001>

<bundles_post_ra>
// kernel: tpu_custom_call.1
= control target key start
LH: loop header
LB: loop body
LE: loop exit
PB: predicated region body
PF: predicated region fallthrough
CT: control target
= control target key end

     0   :  { %v76_v1 = vmov 0   ;;  %s122_s0 = inlined_call_operand.vmem [shape: f32[6,256], index: 0, kind: input, shape index: {}]   ;;  %s123_s1 = inlined_call_operand.vmem [shape: f32[6,1], index: 1, kind: input, shape index: {}]   ;;  %s124_s2 = inlined_call_operand.vmem [shape: f32[6,1], index: 2, kind: input, shape index: {}]   ;;  %s125_s3 = inlined_call_operand.hbm [shape: f32[6,256], index: 3, kind: output, shape index: {}]  }
   0x1   :  { %v17_v0 = vld [vmem:[%s123_s1] sm:$0x3f]  ;;  %51 = vset.pattern.permute.xlu0 %v76_v1 }
   0x2   :  { %8 = vsyncpa [#allocation3], 0  ;;  %21 = vperm.xlu0 %51, %v17_v0   ;;  %v18_v2 = vld [vmem:[%s124_s2] sm:$0x3f]  ;;  %v16_v5 = vld [vmem:[%s122_s0 + $0x8] sm:$0x3f] }
   0x3   :  { %v15_v4 = vld [vmem:[%s122_s0] sm:$0x3f]  ;;  %s77_s20 = smov [#allocation2]  }
   0x4   :  { %s41_s1 = sshll.u32 %s77_s20, 4  ;;  %s42_s1 = int_to_ptr.vmem [resolvable:$true] %s41_s1 }
   0x5   :  { %s52_s2 = scalar_lea.vmem %s42_s1, 256  ;;  %p57_p1 = scmp.lt.s32.totalorder %s42_s1, %s42_s1 }
   0x6   :  { %28 = vperm.xlu0 %51, %v18_v2   ;;  %p53_p0 = scmp.ne.s32.totalorder %s42_s1, %s52_s2  ;;  %p58_p2 = scmp.lt.s32.totalorder %s52_s2, %s52_s2 }
   0x8   :  { %p59_p3 = por %p58_p2, %p57_p1 }
   0xa   :  { %p60_p4 = pnand %p59_p3, %p53_p0 }
  0x81   :  { %v22_v3 = vpop.permute.xlu0 %21 }
  0x82   :  { %v24_v6 = vsub.f32 %v15_v4, %v22_v3  ;;  %v25_v7 = vsub.f32 %v16_v5, %v22_v3 }
  0x85   :  { %v29_v8 = vpop.permute.xlu0 %28 }
  0x86   :  { %v31_v9 = vmul.f32 %v29_v8, %v24_v6  ;;  %v32_v10 = vmul.f32 %v29_v8, %v25_v7 }
  0x88   :  { %33 = vst [vmem:[#allocation2] sm:$0x3f] %v31_v9  ;;  %34 = vst [vmem:[#allocation2 + $0x8] sm:$0x3f] %v32_v10 }
  0x89   :  { %63 = shalt.err (!%p60_p4)
}
  0x8a   :  { %s64_s0 = scalar_lea.hbm %s125_s3, 256 }
  0x8b   :  { %p65_p5 = scmp.ne.s32.totalorder %s125_s3, %s64_s0  ;;  %p68_p6 = scmp.lt.u32.totalorder %s64_s0, %s125_s3 }
  0x8d   :  { %p70_p7 = pnand %p68_p6, %p65_p5 }
  0x8f   :  { %73 = shalt.err (!%p70_p7)
}
  0x90   :  { %44 = dma.vmem_to_hbm [thread:$0]  %s42_s1, 256, %s125_s3, [#allocation3]  }
  0x91   :  { %74 = dma.done.wait [#allocation3], 256  }
  0x92   :  { %75 = vsyncadd [#allocation3], 4294967040 }
  0x93   :  { %48 = vsyncpa [#allocation3], 1 }

</bundles_post_ra>
